<compile_context>
chip_gen: v5e
topology: v5e:2x2
jax: 0.10.0
libtpu: 0.0.40
codegen_flags: <defaults>
</compile_context>

<pallas_src>
import jax
import jax.numpy as jnp
import numpy as np
from jax import lax
from jax.experimental import pallas as pl
from jax.experimental.pallas import tpu as pltpu


# ---------------------------------------------------------------------------
# Pallas kernels
# ---------------------------------------------------------------------------
def _normalize_kernel(x_ref, o_ref):
    # Per-row (= per memory slot) L2 normalization over the feature axis.
    # Equivalent to torch.nn.functional.normalize(bank, dim=0) in the torch
    # (dim, size) layout.  eps matches torch's default (1e-12 on the norm):
    #   x / max(||x||, 1e-12) == x * rsqrt(max(||x||^2, 1e-24))
    x = x_ref[...]
    sumsq = jnp.sum(x * x, axis=1, keepdims=True)
    inv = lax.rsqrt(jnp.maximum(sumsq, 1e-24))      # EUP rsqrt (free VLIW slot)
    o_ref[...] = x * inv


def _enqueue_kernel(ptr_ref, bank_hbm_ref, labels_hbm_ref, batch_ref, blab_ref,
                    new_bank_ref, new_labels_ref, sem_ref):
    # bank/labels inputs are aliased to the outputs (same HBM buffers), so only
    # the B updated rows are written; every other row is preserved in place.
    del bank_hbm_ref, labels_hbm_ref
    ptr = ptr_ref[0]                 # dynamic row offset (SMEM scalar)
    b = batch_ref.shape[0]           # static number of rows written per call
    # NOTE: host logic guarantees ptr + b <= size (wrap is split on the host).
    bank_cp = pltpu.make_async_copy(
        batch_ref, new_bank_ref.at[pl.ds(ptr, b), :], sem_ref.at[0])
    lab_cp = pltpu.make_async_copy(
        blab_ref, new_labels_ref.at[pl.ds(ptr, b), :], sem_ref.at[1])
    bank_cp.start()
    lab_cp.start()
    bank_cp.wait()
    lab_cp.wait()


# ---------------------------------------------------------------------------
# Pallas wrappers
# ---------------------------------------------------------------------------
def normalize_bank(raw, max_tile_rows=512):
    """raw: (size, dim) f32 -> per-row unit-norm (size, dim)."""
    size, dim = raw.shape
    itemsize = jnp.dtype(raw.dtype).itemsize
    # Keep (in + out) x double-buffered tiles well under the scoped VMEM limit
    # on every chip generation (v5e default 16 MiB scoped, v7x 64 MiB physical).
    budget_bytes = 12 * 1024 * 1024
    rows_fit = max(8, budget_bytes // (4 * dim * itemsize))
    tile_rows = int(min(max_tile_rows, size, rows_fit))
    if tile_rows < size:
        tile_rows = max(8, (tile_rows // 8) * 8)    # sublane-aligned tiles
    grid = (pl.cdiv(size, tile_rows),)              # masked tail if not divisible
    return pl.pallas_call(
        _normalize_kernel,
        out_shape=jax.ShapeDtypeStruct((size, dim), raw.dtype),
        grid=grid,
        in_specs=[pl.BlockSpec((tile_rows, dim), lambda i: (i, 0))],
        out_specs=pl.BlockSpec((tile_rows, dim), lambda i: (i, 0)),
        compiler_params=pltpu.CompilerParams(
            dimension_semantics=("parallel",),
            vmem_limit_bytes=32 * 1024 * 1024,
        ),
    )(raw)


def _enqueue_call(bank, labels, batch, batch_labels, ptr_arr):
    size, dim = bank.shape
    any_spec = pl.BlockSpec(memory_space=pl.ANY)      # stay in HBM, no auto-DMA
    vmem = pl.BlockSpec(memory_space=pltpu.MemorySpace.VMEM)
    smem = pl.BlockSpec(memory_space=pltpu.MemorySpace.SMEM)
    return pl.pallas_call(
        _enqueue_kernel,
        out_shape=(jax.ShapeDtypeStruct((size, dim), bank.dtype),
                   jax.ShapeDtypeStruct(labels.shape, labels.dtype)),
        in_specs=[smem, any_spec, any_spec, vmem, vmem],
        out_specs=(any_spec, any_spec),
        scratch_shapes=[pltpu.SemaphoreType.DMA((2,))],
        input_output_aliases={1: 0, 2: 1},  # bank -> new_bank, labels -> new_labels
        compiler_params=pltpu.CompilerParams(has_side_effects=True),
    )(ptr_arr, bank, labels, batch, batch_labels)


# Donate bank/labels so the pallas aliasing is truly in-place (no hidden copy).
_enqueue_jit = jax.jit(_enqueue_call, donate_argnums=(0, 1))


def enqueue(bank, labels, batch, batch_labels, ptr):
    """Write `batch` (B, dim) / `batch_labels` (B,) into slots [ptr, ptr+B)."""
    b = batch.shape[0]
    ptr_arr = jnp.asarray([ptr], dtype=jnp.int32)
    blab2d = batch_labels.astype(labels.dtype).reshape(b, 1)
    return _enqueue_jit(bank, labels, batch.astype(bank.dtype), blab2d, ptr_arr)


# ---------------------------------------------------------------------------
# Module (stateful Python wrapper mirroring the torch nn.Module semantics)
# ---------------------------------------------------------------------------
class LabeledMemoryBank:
    def __init__(self, num_classes=3, size=2 ** 16, seed=0):
        if size < 0:
            raise ValueError(f"Illegal memory bank size {size}, must be non-negative.")
        self.size = size
        self.num_classes = num_classes
        self.first_pass = True
        self.bank = None      # internal layout: (size, dim) float32
        self.labels = None    # internal layout: (size, 1) int32
        self.ptr = 0
        self._key = jax.random.PRNGKey(seed)

    def _init_memory_bank(self, dim):
        k1, k2 = jax.random.split(self._key)
        raw = jax.random.normal(k1, (self.size, dim), dtype=jnp.float32)
        self.bank = normalize_bank(raw)                       # Pallas kernel
        self.labels = jax.random.randint(k2, (self.size, 1), 0,
                                         self.num_classes, dtype=jnp.int32)
        self.ptr = 0

    def _dequeue_and_enqueue(self, batch, labels):
        b = batch.shape[0]
        ptr = self.ptr
        if ptr + b >= self.size:
            self.first_pass = False
            n_first = self.size - ptr
            self.bank, self.labels = enqueue(self.bank, self.labels,
                                             batch[:n_first], labels[:n_first], ptr)
            new_ptr = (ptr + b) % self.size
            if new_ptr > 0:  # wrap-around remainder
                self.bank, self.labels = enqueue(self.bank, self.labels,
                                                 batch[n_first:], labels[n_first:], 0)
            self.ptr = new_ptr
        else:
            self.bank, self.labels = enqueue(self.bank, self.labels,
                                             batch, labels, ptr)
            self.ptr = ptr + b

    def __call__(self, output, labels=None, update=False):
        if self.size == 0:
            return output, None, None
        _, dim = output.shape
        if self.bank is None:
            self._init_memory_bank(dim)
        # "clone().detach()": slices/transposes below materialize fresh buffers,
        # which also keeps the returned snapshots valid across the donating
        # (in-place) enqueue update.
        if self.first_pass:
            ptr = self.ptr
            if ptr == 0:
                bank_out = None
                labels_out = None
            else:
                bank_out = jnp.transpose(self.bank[:ptr])   # (dim, ptr) torch layout
                labels_out = self.labels[:ptr, 0]
        else:
            bank_out = jnp.transpose(self.bank)             # (dim, size) torch layout
            labels_out = self.labels[:, 0]
        if update:
            self._dequeue_and_enqueue(output, labels)
        return output, bank_out, labels_out

    # keep a torch-like alias
    forward = __call__


# ---------------------------------------------------------------------------
if __name__ == "__main__":
    key = jax.random.PRNGKey(0)
    b, dim, size, num_classes = 8, 32, 128, 3
    k1, k2, k3, k4, k5, k6 = jax.random.split(key, 6)
    output = jax.random.normal(k1, (b, dim), dtype=jnp.float32)
    batch_labels = jax.random.randint(k2, (b,), 0, num_classes, dtype=jnp.int32)

    mem = LabeledMemoryBank(num_classes=num_classes, size=size, seed=0)

    # Call 1: first pass, ptr == 0 -> bank / labels are None; enqueue the batch.
    out1, bank1, lab1 = mem(output, batch_labels, update=True)
    assert bank1 is None and lab1 is None
    jax.block_until_ready(out1)

    # Call 2: still first pass, ptr == b -> bank slice of width b is returned.
    out2, bank2, lab2 = mem(output, batch_labels, update=False)
    jax.block_until_ready((out2, bank2, lab2))
    assert bank2.shape == (dim, b)
    assert lab2.shape == (b,)
    np.testing.assert_allclose(np.asarray(bank2).T, np.asarray(output),
                               rtol=1e-6, atol=1e-6)
    np.testing.assert_array_equal(np.asarray(lab2), np.asarray(batch_labels))

    # Untouched slots must be unit-norm (normalize kernel + the in-place
    # aliased enqueue must have preserved them).
    full_bank = np.asarray(mem.bank)            # (size, dim) internal layout
    norms = np.linalg.norm(full_bank[b:], axis=1)
    np.testing.assert_allclose(norms, np.ones_like(norms), rtol=1e-5, atol=1e-5)

    # Call 3: fill the bank exactly -> leaves first pass, ptr wraps to 0.
    big = jax.random.normal(k3, (size - b, dim), dtype=jnp.float32)
    big_labels = jax.random.randint(k4, (size - b,), 0, num_classes, dtype=jnp.int32)
    mem(big, big_labels, update=True)
    assert not mem.first_pass and mem.ptr == 0

    out4, bank4, lab4 = mem(output, batch_labels, update=False)
    jax.block_until_ready((bank4, lab4))
    assert bank4.shape == (dim, size) and lab4.shape == (size,)
    np.testing.assert_allclose(np.asarray(bank4)[:, :b].T, np.asarray(output),
                               rtol=1e-6, atol=1e-6)
    np.testing.assert_allclose(np.asarray(bank4)[:, b:].T, np.asarray(big),
                               rtol=1e-6, atol=1e-6)
    np.testing.assert_array_equal(np.asarray(lab4)[b:], np.asarray(big_labels))

    # Calls 4+5: wrap-around update with a remainder (two row windows).
    mem(output, batch_labels, update=True)               # ptr 0 -> 8
    wrap_n = size - b + 5                                # 120 rows at ptr=8, 5 at 0
    wrap_batch = jax.random.normal(k5, (wrap_n, dim), dtype=jnp.float32)
    wrap_labels = jax.random.randint(k6, (wrap_n,), 0, num_classes, dtype=jnp.int32)
    mem(wrap_batch, wrap_labels, update=True)
    assert mem.ptr == 5
    bank_np = np.asarray(mem.bank)
    lab_np = np.asarray(mem.labels)[:, 0]
    np.testing.assert_allclose(bank_np[b:], np.asarray(wrap_batch)[:size - b],
                               rtol=1e-6, atol=1e-6)
    np.testing.assert_allclose(bank_np[:5], np.asarray(wrap_batch)[size - b:],
                               rtol=1e-6, atol=1e-6)
    np.testing.assert_allclose(bank_np[5:b], np.asarray(output)[5:b],
                               rtol=1e-6, atol=1e-6)
    np.testing.assert_array_equal(lab_np[b:], np.asarray(wrap_labels)[:size - b])
    np.testing.assert_array_equal(lab_np[:5], np.asarray(wrap_labels)[size - b:])

    print("KERNEL_OK")
</pallas_src>

<mosaic_0001>
module attributes {stable_mosaic.version = 11 : i64} {
  func.func @_normalize_kernel(%arg0: i32, %arg1: memref<128x32xf32, #tpu.memory_space<vmem>>, %arg2: memref<128x32xf32, #tpu.memory_space<vmem>>) attributes {dimension_semantics = [#tpu.dimension_semantics<parallel>], iteration_bounds = array<i64: 1>, scalar_prefetch = 0 : i64, scratch_operands = 0 : i64, tpu.core_type = #tpu.core_type<tc>, window_params = [{transform_indices = @transform_0, window_bounds = array<i64: 128, 32>}, {transform_indices = @transform_1, window_bounds = array<i64: 128, 32>}]} {
    %c0 = arith.constant 0 : index
    %c0_0 = arith.constant 0 : index
    %0 = vector.load %arg1[%c0, %c0_0] : memref<128x32xf32, #tpu.memory_space<vmem>>, vector<128x32xf32>
    %1 = arith.mulf %0, %0 : vector<128x32xf32>
    %cst = arith.constant dense<0.000000e+00> : vector<128xf32>
    %2 = vector.multi_reduction <add>, %1, %cst [1] : vector<128x32xf32> to vector<128xf32>
    %3 = vector.shape_cast %2 : vector<128xf32> to vector<128x1xf32>
    %cst_1 = arith.constant 1.000000e-24 : f32
    %4 = vector.broadcast %cst_1 : f32 to vector<128x1xf32>
    %5 = arith.maximumf %3, %4 : vector<128x1xf32>
    %6 = math.rsqrt %5 : vector<128x1xf32>
    %7 = vector.broadcast %6 : vector<128x1xf32> to vector<128x32xf32>
    %8 = arith.mulf %0, %7 : vector<128x32xf32>
    %c0_2 = arith.constant 0 : index
    %c0_3 = arith.constant 0 : index
    %9 = vector.load %arg2[%c0_2, %c0_3] : memref<128x32xf32, #tpu.memory_space<vmem>>, vector<128x32xf32>
    tpu.vector_store %arg2[%c0_2, %c0_3], %8 {strides = array<i32>} : memref<128x32xf32, #tpu.memory_space<vmem>>, vector<128x32xf32>,
    return
  }
  func.func @transform_0(%arg0: i32) -> (i32, i32) {
    %c0_i32 = arith.constant 0 : i32
    %c0_i32_0 = arith.constant 0 : i32
    return %arg0, %c0_i32 : i32, i32
  }
  func.func @transform_1(%arg0: i32) -> (i32, i32) {
    %c0_i32 = arith.constant 0 : i32
    %c0_i32_0 = arith.constant 0 : i32
    return %arg0, %c0_i32 : i32, i32
  }
}

</mosaic_0001>

<bundles_post_ra>
// kernel: tpu_custom_call.1
= control target key start
LH: loop header
LB: loop body
LE: loop exit
PB: predicated region body
PF: predicated region fallthrough
CT: control target
= control target key end

     0   :  { %vm40_vm0 = vcmask 261120   ;;  %s669_s0 = inlined_call_operand.vmem [shape: f32[128,32], index: 0, kind: input, shape index: {}]   ;;  %s670_s1 = inlined_call_operand.vmem [shape: f32[128,32], index: 1, kind: output, shape index: {}]  }
   0x1   :  { %v346_v0 = vld [vmem:[%s669_s0 + $0x20] sm:$0xff]  ;;  %v351_v1 = vld [vmem:[%s669_s0 + $0x10] sm:$0xff]  ;;  %v367_v6 = vld [vmem:[%s669_s0 + $0x28] sm:$0xff] }
   0x2   :  { %v356_v2 = vld [vmem:[%s669_s0] sm:$0xff]  ;;  %v28_v3 = vmul.f32 %v346_v0, %v346_v0  ;;  %v26_v4 = vmul.f32 %v351_v1, %v351_v1  ;;  %v372_v7 = vld [vmem:[%s669_s0 + $0x18] sm:$0xff]  ;;  %v380_v11 = vld [vmem:[%s669_s0 + $0x8] sm:$0xff]  ;;  %v29_v12 = vmul.f32 %v367_v6, %v367_v6 }
   0x3   :  { %v24_v5 = vmul.f32 %v356_v2, %v356_v2  ;;  %v27_v13 = vmul.f32 %v372_v7, %v372_v7  ;;  %v25_v14 = vmul.f32 %v380_v11, %v380_v11  ;;  %v394_v18 = vld [vmem:[%s669_s0 + $0x40] sm:$0xff]  ;;  %v399_v19 = vld [vmem:[%s669_s0 + $0x38] sm:$0xff]  ;;  %v404_v20 = vld [vmem:[%s669_s0 + $0x30] sm:$0xff] }
   0x4   :  { %v53_v8 = vsel %vm40_vm0, %v28_v3, 0.0  ;;  %v47_v9 = vsel %vm40_vm0, %v26_v4, 0.0  ;;  %v56_v15 = vsel %vm40_vm0, %v29_v12, 0.0  ;;  %v32_v21 = vmul.f32 %v394_v18, %v394_v18  ;;  %v418_v27 = vld [vmem:[%s669_s0 + $0x58] sm:$0xff]  ;;  %v423_v28 = vld [vmem:[%s669_s0 + $0x50] sm:$0xff]  ;;  %v428_v29 = vld [vmem:[%s669_s0 + $0x48] sm:$0xff] }
   0x5   :  { %v41_v10 = vsel %vm40_vm0, %v24_v5, 0.0  ;;  %54 = vadd.xlane.f32.xlu2 %v53_v8  ;;  %48 = vadd.xlane.f32.xlu1 %v47_v9  ;;  %v50_v16 = vsel %vm40_vm0, %v27_v13, 0.0  ;;  %v44_v17 = vsel %vm40_vm0, %v25_v14, 0.0  ;;  %v31_v22 = vmul.f32 %v399_v19, %v399_v19  ;;  %v442_v36 = vld [vmem:[%s669_s0 + $0x70] sm:$0xff]  ;;  %v447_v37 = vld [vmem:[%s669_s0 + $0x68] sm:$0xff]  ;;  %v452_v38 = vld [vmem:[%s669_s0 + $0x60] sm:$0xff] }
   0x6   :  { %42 = vadd.xlane.f32.xlu0 %v41_v10  ;;  %v30_v23 = vmul.f32 %v404_v20, %v404_v20  ;;  %v65_v24 = vsel %vm40_vm0, %v32_v21, 0.0  ;;  %v35_v30 = vmul.f32 %v418_v27, %v418_v27  ;;  %v34_v31 = vmul.f32 %v423_v28, %v423_v28  ;;  %v466_v45 = vld [vmem:[%s669_s0 + $0x78] sm:$0xff] }
   0x7   :  { %v62_v25 = vsel %vm40_vm0, %v31_v22, 0.0  ;;  %v33_v32 = vmul.f32 %v428_v29, %v428_v29  ;;  %v38_v39 = vmul.f32 %v442_v36, %v442_v36  ;;  %v37_v40 = vmul.f32 %v447_v37, %v447_v37 }
   0x8   :  { %v59_v26 = vsel %vm40_vm0, %v30_v23, 0.0  ;;  %v74_v33 = vsel %vm40_vm0, %v35_v30, 0.0  ;;  %v71_v34 = vsel %vm40_vm0, %v34_v31, 0.0  ;;  %v36_v41 = vmul.f32 %v452_v38, %v452_v38 }
   0x9   :  { %v68_v35 = vsel %vm40_vm0, %v33_v32, 0.0  ;;  %v83_v42 = vsel %vm40_vm0, %v38_v39, 0.0  ;;  %v80_v43 = vsel %vm40_vm0, %v37_v40, 0.0  ;;  %v39_v46 = vmul.f32 %v466_v45, %v466_v45 }
   0xa   :  { %v77_v44 = vsel %vm40_vm0, %v36_v41, 0.0 }
   0xb   :  { %v86_v47 = vsel %vm40_vm0, %v39_v46, 0.0 }
   0xd   :  { %57 = vadd.xlane.f32.xlu2 %v56_v15  ;;  %51 = vadd.xlane.f32.xlu1 %v50_v16 }
   0xe   :  { %45 = vadd.xlane.f32.xlu0 %v44_v17 }
  0x15   :  { %66 = vadd.xlane.f32.xlu2 %v65_v24  ;;  %63 = vadd.xlane.f32.xlu1 %v62_v25 }
  0x16   :  { %60 = vadd.xlane.f32.xlu0 %v59_v26 }
  0x1d   :  { %75 = vadd.xlane.f32.xlu2 %v74_v33  ;;  %72 = vadd.xlane.f32.xlu1 %v71_v34 }
  0x1e   :  { %69 = vadd.xlane.f32.xlu0 %v68_v35 }
  0x25   :  { %84 = vadd.xlane.f32.xlu2 %v83_v42  ;;  %81 = vadd.xlane.f32.xlu1 %v80_v43 }
  0x26   :  { %78 = vadd.xlane.f32.xlu0 %v77_v44 }
  0x2e   :  { %87 = vadd.xlane.f32.xlu0 %v86_v47 }
  0x78   :  { %v55_v48 = vpop.xlane.xlu2 %54  ;;  %v49_v49 = vpop.xlane.xlu1 %48 }
  0x79   :  { %v93_v50 = vmax.f32 %v55_v48, 1e-24  ;;  %v91_v51 = vmax.f32 %v49_v49, 1e-24  ;;  %v43_v52 = vpop.xlane.xlu0 %42 }
  0x7a   :  { %v89_v53 = vmax.f32 %v43_v52, 1e-24 }
  0x7b   :  { %301 = vrsqrt.f32 %v93_v50  ;;  %vm151_vm1 = vweird.f32 %v93_v50  ;;  %vm131_vm3 = vweird.f32 %v91_v51 }
  0x7c   :  { %303 = vrsqrt.f32 %v91_v51  ;;  %vm111_vm5 = vweird.f32 %v89_v53 }
  0x7d   :  { %305 = vrsqrt.f32 %v89_v53 }
  0x80   :  { %v58_v54 = vpop.xlane.xlu2 %57  ;;  %v52_v55 = vpop.xlane.xlu1 %51 }
  0x81   :  { %v302_v56 = vpop.eup %301  ;;  %v471_v57 = vmax.f32 %v58_v54, 1e-24  ;;  %v473_v58 = vmax.f32 %v52_v55, 1e-24  ;;  %v46_v59 = vpop.xlane.xlu0 %45 }
  0x82   :  { %v304_v60 = vpop.eup %303  ;;  %v146_v61 = vmul.f32 %v302_v56, %v93_v50  ;;  %v475_v62 = vmax.f32 %v46_v59, 1e-24  ;;  %vm152_vm2 = vweird.f32 %v302_v56 }
  0x83   :  { %v306_v63 = vpop.eup %305  ;;  %v126_v3 = vmul.f32 %v304_v60, %v91_v51  ;;  %307 = vrsqrt.f32 %v471_v57  ;;  %vm132_vm4 = vweird.f32 %v304_v60  ;;  %vm153_vm7 = vmor %vm151_vm1, %vm152_vm2  ;;  %vm161_vm10 = vweird.f32 %v471_v57 }
  0x84   :  { %v147_v4 = vmul.f32 %v302_v56, %v146_v61  ;;  %v106_v5 = vmul.f32 %v306_v63, %v89_v53  ;;  %309 = vrsqrt.f32 %v473_v58  ;;  %vm112_vm6 = vweird.f32 %v306_v63  ;;  %vm133_vm8 = vmor %vm131_vm3, %vm132_vm4 }
  0x85   :  { %v127_v8 = vmul.f32 %v304_v60, %v126_v3  ;;  %311 = vrsqrt.f32 %v475_v62  ;;  %vm113_vm9 = vmor %vm111_vm5, %vm112_vm6  ;;  %vm141_vm11 = vweird.f32 %v473_v58  ;;  %vm121_vm1 = vweird.f32 %v475_v62 }
  0x86   :  { %v148_v9 = vmul.f32 0.5, %v147_v4  ;;  %v107_v10 = vmul.f32 %v306_v63, %v106_v5 }
  0x87   :  { %v128_v12 = vmul.f32 0.5, %v127_v8 }
  0x88   :  { %v149_v13 = vsub.f32 1.5, %v148_v9  ;;  %v108_v14 = vmul.f32 0.5, %v107_v10  ;;  %v67_v15 = vpop.xlane.xlu2 %66  ;;  %v64_v16 = vpop.xlane.xlu1 %63 }
  0x89   :  { %v480_v17 = vpop.eup %307  ;;  %v129_v21 = vsub.f32 1.5, %v128_v12  ;;  %v482_v22 = vmax.f32 %v67_v15, 1e-24  ;;  %v61_v23 = vpop.xlane.xlu0 %60  ;;  %v495_v34 = vmax.f32 %v64_v16, 1e-24 }
  0x8a   :  { %v484_v24 = vpop.eup %309  ;;  %v150_v25 = vmul.f32 %v302_v56, %v149_v13  ;;  %v109_v26 = vsub.f32 1.5, %v108_v14  ;;  %v156_v30 = vmul.f32 %v480_v17, %v471_v57  ;;  %vm162_vm12 = vweird.f32 %v480_v17 }
  0x8b   :  { %v488_v31 = vpop.eup %311  ;;  %v130_v32 = vmul.f32 %v304_v60, %v129_v21  ;;  %v136_v33 = vmul.f32 %v484_v24, %v473_v58  ;;  %313 = vrsqrt.f32 %v482_v22  ;;  %v521_v52 = vmax.f32 %v61_v23, 1e-24  ;;  %vm163_vm15 = vmor %vm161_vm10, %vm162_vm12 }
  0x8c   :  { %v154_v35 = vsel %vm153_vm7, %v302_v56, %v150_v25  ;;  %v110_v39 = vmul.f32 %v306_v63, %v109_v26  ;;  %v157_v40 = vmul.f32 %v480_v17, %v156_v30  ;;  %v116_v41 = vmul.f32 %v488_v31, %v475_v62 }
  0x8d   :  { %v269_v42 = vmul.f32 %v154_v35, %v346_v0  ;;  %v134_v43 = vsel %vm133_vm8, %v304_v60, %v130_v32  ;;  %v137_v44 = vmul.f32 %v484_v24, %v136_v33  ;;  %315 = vrsqrt.f32 %v495_v34 }
  0x8e   :  { %v267_v46 = vmul.f32 %v134_v43, %v351_v1  ;;  %v114_v47 = vsel %vm113_vm9, %v306_v63, %v110_v39  ;;  %v158_v48 = vmul.f32 0.5, %v157_v40  ;;  %v117_v49 = vmul.f32 %v488_v31, %v116_v41 }
  0x8f   :  { %285 = vst.msk [vmem:[%s670_s1 + $0x20] sm:$0xff] %vm40_vm0, %v269_v42  ;;  %v265_v0 = vmul.f32 %v114_v47, %v356_v2  ;;  %v138_v50 = vmul.f32 0.5, %v137_v44  ;;  %vm142_vm13 = vweird.f32 %v484_v24  ;;  %vm122_vm14 = vweird.f32 %v488_v31 }
  0x90   :  { %283 = vst.msk [vmem:[%s670_s1 + $0x10] sm:$0xff] %vm40_vm0, %v267_v46  ;;  %v159_v1 = vsub.f32 1.5, %v158_v48  ;;  %v118_v51 = vmul.f32 0.5, %v117_v49  ;;  %v76_v53 = vpop.xlane.xlu2 %75  ;;  %v73_v54 = vpop.xlane.xlu1 %72  ;;  %317 = vrsqrt.f32 %v521_v52  ;;  %vm143_vm2 = vmor %vm141_vm11, %vm142_vm13  ;;  %vm191_vm4 = vweird.f32 %v482_v22 }
  0x91   :  { %v314_v55 = vpop.eup %313  ;;  %281 = vst.msk [vmem:[%s670_s1] sm:$0xff] %vm40_vm0, %v265_v0  ;;  %v139_v2 = vsub.f32 1.5, %v138_v50  ;;  %v528_v56 = vmax.f32 %v76_v53, 1e-24  ;;  %v530_v59 = vmax.f32 %v73_v54, 1e-24  ;;  %v70_v60 = vpop.xlane.xlu0 %69  ;;  %vm123_vm3 = vmor %vm121_vm1, %vm122_vm14  ;;  %vm181_vm6 = vweird.f32 %v495_v34 }
  0x92   :  { %v160_v61 = vmul.f32 %v480_v17, %v159_v1  ;;  %v119_v63 = vsub.f32 1.5, %v118_v51  ;;  %v186_v3 = vmul.f32 %v314_v55, %v482_v22  ;;  %vm192_vm5 = vweird.f32 %v314_v55 }
  0x93   :  { %v140_v4 = vmul.f32 %v484_v24, %v139_v2  ;;  %319 = vrsqrt.f32 %v528_v56  ;;  %v316_v10 = vpop.eup %315  ;;  %vm193_vm7 = vmor %vm191_vm4, %vm192_vm5  ;;  %vm171_vm9 = vweird.f32 %v521_v52  ;;  %vm221_vm10 = vweird.f32 %v528_v56 }
  0x94   :  { %v164_v5 = vsel %vm163_vm15, %v480_v17, %v160_v61  ;;  %v120_v8 = vmul.f32 %v488_v31, %v119_v63  ;;  %v187_v9 = vmul.f32 %v314_v55, %v186_v3  ;;  %321 = vrsqrt.f32 %v530_v59 }
  0x95   :  { %v270_v57 = vmul.f32 %v164_v5, %v367_v6  ;;  %v144_v12 = vsel %vm143_vm2, %v484_v24, %v140_v4  ;;  %v176_v58 = vmul.f32 %v316_v10, %v495_v34  ;;  %v558_v6 = vmax.f32 %v70_v60, 1e-24 }
  0x96   :  { %v268_v62 = vmul.f32 %v144_v12, %v372_v7  ;;  %v124_v13 = vsel %vm123_vm3, %v488_v31, %v120_v8  ;;  %v188_v14 = vmul.f32 0.5, %v187_v9  ;;  %v318_v23 = vpop.eup %317  ;;  %vm182_vm8 = vweird.f32 %v316_v10 }
  0x97   :  { %286 = vst.msk [vmem:[%s670_s1 + $0x28] sm:$0xff] %vm40_vm0, %v270_v57  ;;  %v266_v15 = vmul.f32 %v124_v13, %v380_v11  ;;  %v177_v16 = vmul.f32 %v316_v10, %v176_v58  ;;  %323 = vrsqrt.f32 %v558_v6  ;;  %v166_v32 = vmul.f32 %v318_v23, %v521_v52  ;;  %vm183_vm12 = vmor %vm181_vm6, %vm182_vm8 }
  0x98   :  { %284 = vst.msk [vmem:[%s670_s1 + $0x18] sm:$0xff] %vm40_vm0, %v268_v62  ;;  %v189_v7 = vsub.f32 1.5, %v188_v14  ;;  %v85_v17 = vpop.xlane.xlu2 %84  ;;  %v82_v21 = vpop.xlane.xlu1 %81  ;;  %vm211_vm11 = vweird.f32 %v530_v59  ;;  %vm172_vm13 = vweird.f32 %v318_v23  ;;  %vm201_vm2 = vweird.f32 %v558_v6 }
  0x99   :  { %282 = vst.msk [vmem:[%s670_s1 + $0x8] sm:$0xff] %vm40_vm0, %v266_v15  ;;  %v570_v11 = vmax.f32 %v85_v17, 1e-24  ;;  %v572_v24 = vmax.f32 %v82_v21, 1e-24  ;;  %v79_v25 = vpop.xlane.xlu0 %78  ;;  %v320_v26 = vpop.eup %319  ;;  %v178_v31 = vmul.f32 0.5, %v177_v16  ;;  %v167_v41 = vmul.f32 %v318_v23, %v166_v32  ;;  %vm173_vm1 = vmor %vm171_vm9, %vm172_vm13 }
  0x9a   :  { %v190_v30 = vmul.f32 %v314_v55, %v189_v7  ;;  %v322_v33 = vpop.eup %321  ;;  %v216_v35 = vmul.f32 %v320_v26, %v528_v56  ;;  %vm222_vm14 = vweird.f32 %v320_v26  ;;  %v594_v49 = vmax.f32 %v79_v25, 1e-24 }
  0x9b   :  { %325 = vrsqrt.f32 %v570_v11  ;;  %v179_v40 = vsub.f32 1.5, %v178_v31  ;;  %v206_v42 = vmul.f32 %v322_v33, %v530_v59  ;;  %v168_v46 = vmul.f32 0.5, %v167_v41  ;;  %vm223_vm3 = vmor %vm221_vm10, %vm222_vm14 }
  0x9c   :  { %v194_v39 = vsel %vm193_vm7, %v314_v55, %v190_v30  ;;  %v217_v44 = vmul.f32 %v320_v26, %v216_v35  ;;  %327 = vrsqrt.f32 %v572_v24  ;;  %vm212_vm15 = vweird.f32 %v322_v33 }
  0x9d   :  { %v273_v43 = vmul.f32 %v194_v39, %v394_v18  ;;  %v180_v22 = vmul.f32 %v316_v10, %v179_v40  ;;  %v207_v47 = vmul.f32 %v322_v33, %v206_v42  ;;  %v324_v48 = vpop.eup %323  ;;  %v169_v50 = vsub.f32 1.5, %v168_v46  ;;  %vm213_vm4 = vmor %vm211_vm11, %vm212_vm15 }
  0x9e   :  { %v218_v18 = vmul.f32 0.5, %v217_v44  ;;  %v196_v51 = vmul.f32 %v324_v48, %v558_v6  ;;  %329 = vrsqrt.f32 %v594_v49  ;;  %vm202_vm5 = vweird.f32 %v324_v48 }
  0x9f   :  { %289 = vst.msk [vmem:[%s670_s1 + $0x40] sm:$0xff] %vm40_vm0, %v273_v43  ;;  %v184_v0 = vsel %vm183_vm12, %v316_v10, %v180_v22  ;;  %v208_v1 = vmul.f32 0.5, %v207_v47  ;;  %v170_v34 = vmul.f32 %v318_v23, %v169_v50  ;;  %vm251_vm6 = vweird.f32 %v570_v11  ;;  %vm203_vm8 = vmor %vm201_vm2, %vm202_vm5 }
  0xa0   :  { %v272_v54 = vmul.f32 %v184_v0, %v399_v19  ;;  %v219_v55 = vsub.f32 1.5, %v218_v18  ;;  %v197_v61 = vmul.f32 %v324_v48, %v196_v51  ;;  %vm241_vm10 = vweird.f32 %v572_v24 }
  0xa1   :  { %v326_v53 = vpop.eup %325  ;;  %v88_v2 = vpop.xlane.xlu0 %87  ;;  %v209_v60 = vsub.f32 1.5, %v208_v1  ;;  %v174_v5 = vsel %vm173_vm1, %v318_v23, %v170_v34  ;;  %vm231_vm14 = vweird.f32 %v594_v49 }
  0xa2   :  { %v246_v63 = vmul.f32 %v326_v53, %v570_v11  ;;  %v328_v3 = vpop.eup %327  ;;  %288 = vst.msk [vmem:[%s670_s1 + $0x38] sm:$0xff] %vm40_vm0, %v272_v54  ;;  %v220_v19 = vmul.f32 %v320_v26, %v219_v55  ;;  %v608_v4 = vmax.f32 %v88_v2, 1e-24  ;;  %v198_v9 = vmul.f32 0.5, %v197_v61 }
  0xa3   :  { %v210_v8 = vmul.f32 %v322_v33, %v209_v60  ;;  %v271_v57 = vmul.f32 %v174_v5, %v404_v20  ;;  %v236_v52 = vmul.f32 %v328_v3, %v572_v24  ;;  %vm252_vm7 = vweird.f32 %v326_v53 }
  0xa4   :  { %v247_v10 = vmul.f32 %v326_v53, %v246_v63  ;;  %v224_v12 = vsel %vm223_vm3, %v320_v26, %v220_v19  ;;  %v199_v14 = vsub.f32 1.5, %v198_v9  ;;  %v330_v56 = vpop.eup %329  ;;  %331 = vrsqrt.f32 %v608_v4  ;;  %vm253_vm9 = vmor %vm251_vm6, %vm252_vm7 }
  0xa5   :  { %v276_v62 = vmul.f32 %v224_v12, %v418_v27  ;;  %v214_v13 = vsel %vm213_vm4, %v322_v33, %v210_v8  ;;  %287 = vst.msk [vmem:[%s670_s1 + $0x30] sm:$0xff] %vm40_vm0, %v271_v57  ;;  %v237_v59 = vmul.f32 %v328_v3, %v236_v52  ;;  %v226_v7 = vmul.f32 %v330_v56, %v594_v49 }
  0xa6   :  { %v248_v58 = vmul.f32 0.5, %v247_v10  ;;  %v275_v20 = vmul.f32 %v214_v13, %v423_v28  ;;  %v200_v27 = vmul.f32 %v324_v48, %v199_v14  ;;  %vm242_vm11 = vweird.f32 %v328_v3 }
  0xa7   :  { %292 = vst.msk [vmem:[%s670_s1 + $0x58] sm:$0xff] %vm40_vm0, %v276_v62  ;;  %v238_v28 = vmul.f32 0.5, %v237_v59  ;;  %v227_v21 = vmul.f32 %v330_v56, %v226_v7  ;;  %vm243_vm12 = vmor %vm241_vm10, %vm242_vm11  ;;  %vm232_vm13 = vweird.f32 %v330_v56  ;;  %vm261_vm2 = vweird.f32 %v608_v4 }
  0xa8   :  { %v249_v15 = vsub.f32 1.5, %v248_v58  ;;  %291 = vst.msk [vmem:[%s670_s1 + $0x50] sm:$0xff] %vm40_vm0, %v275_v20  ;;  %v204_v16 = vsel %vm203_vm8, %v324_v48, %v200_v27  ;;  %vm233_vm15 = vmor %vm231_vm14, %vm232_vm13 }
  0xa9   :  { %v274_v23 = vmul.f32 %v204_v16, %v428_v29  ;;  %v239_v25 = vsub.f32 1.5, %v238_v28  ;;  %v228_v30 = vmul.f32 0.5, %v227_v21 }
  0xaa   :  { %v250_v17 = vmul.f32 %v326_v53, %v249_v15  ;;  %v332_v31 = vpop.eup %331 }
  0xab   :  { %290 = vst.msk [vmem:[%s670_s1 + $0x48] sm:$0xff] %vm40_vm0, %v274_v23  ;;  %v240_v32 = vmul.f32 %v328_v3, %v239_v25  ;;  %v229_v29 = vsub.f32 1.5, %v228_v30  ;;  %v256_v11 = vmul.f32 %v332_v31, %v608_v4  ;;  %vm262_vm1 = vweird.f32 %v332_v31 }
  0xac   :  { %v254_v26 = vsel %vm253_vm9, %v326_v53, %v250_v17  ;;  %vm263_vm3 = vmor %vm261_vm2, %vm262_vm1 }
  0xad   :  { %v279_v6 = vmul.f32 %v254_v26, %v442_v36  ;;  %v244_v24 = vsel %vm243_vm12, %v328_v3, %v240_v32  ;;  %v230_v35 = vmul.f32 %v330_v56, %v229_v29  ;;  %v257_v39 = vmul.f32 %v332_v31, %v256_v11 }
  0xae   :  { %v278_v33 = vmul.f32 %v244_v24, %v447_v37 }
  0xaf   :  { %295 = vst.msk [vmem:[%s670_s1 + $0x70] sm:$0xff] %vm40_vm0, %v279_v6  ;;  %v234_v36 = vsel %vm233_vm15, %v330_v56, %v230_v35  ;;  %v258_v40 = vmul.f32 0.5, %v257_v39 }
  0xb0   :  { %294 = vst.msk [vmem:[%s670_s1 + $0x68] sm:$0xff] %vm40_vm0, %v278_v33  ;;  %v277_v41 = vmul.f32 %v234_v36, %v452_v38 }
  0xb1   :  { %v259_v42 = vsub.f32 1.5, %v258_v40 }
  0xb2   :  { %293 = vst.msk [vmem:[%s670_s1 + $0x60] sm:$0xff] %vm40_vm0, %v277_v41 }
  0xb3   :  { %v260_v37 = vmul.f32 %v332_v31, %v259_v42 }
  0xb5   :  { %v264_v43 = vsel %vm263_vm3, %v332_v31, %v260_v37 }
  0xb6   :  { %v280_v44 = vmul.f32 %v264_v43, %v466_v45 }
  0xb8   :  { %296 = vst.msk [vmem:[%s670_s1 + $0x78] sm:$0xff] %vm40_vm0, %v280_v44 }

</bundles_post_ra>
